<compile_context>
chip_gen: v6e
topology: v6e:2x2x1
jax: 0.10.0
libtpu: 0.0.40
codegen_flags: <defaults>
</compile_context>

<pallas_src>
import functools

import jax
import jax.numpy as jnp
from jax.experimental import pallas as pl
from jax.experimental.pallas import tpu as pltpu


# --------------------------------------------------------------------------
# Pallas kernel: trunk hidden MLP + fused DeepONet selector, feature-major.
# Output block is (n10_pad, TB): multiple-of-8 sublanes, lane-dense stores.
# --------------------------------------------------------------------------
def make_main_kernel(trunk_layer):
    n_hidden_w = max(trunk_layer - 1, 0)     # hidden (Wt, Wt) weights

    def kernel(*refs):
        idx = 0
        x_ref = refs[idx]; idx += 1                              # (2, TB)
        c0_ref = refs[idx]; idx += 1                             # (Wt, 1) = W0^T[:,0:1]
        c1_ref = refs[idx]; idx += 1                             # (Wt, 1) = W0^T[:,1:2]
        wts = refs[idx:idx + n_hidden_w]; idx += n_hidden_w      # W1^T..W_{L-1}^T (Wt, Wt)
        bts = refs[idx:idx + trunk_layer]; idx += trunk_layer    # b0^T..b_{L-1}^T (Wt, 1)
        wf_ref = refs[idx]; idx += 1                             # (n10_pad, Wt) fused selector
        bf_ref = refs[idx]; idx += 1                             # (n10_pad, 1)  fused bias
        out_ref = refs[idx]; idx += 1                            # (n10_pad, TB)

        f32 = jnp.float32
        hp = jax.lax.Precision.HIGHEST
        xT = x_ref[...]                                          # (2, TB)

        # First trunk layer: K=2 -> two rank-1 VPU updates instead of the MXU.
        h = jnp.tanh(c0_ref[...] * xT[0:1, :] + c1_ref[...] * xT[1:2, :]
                     + bts[0][...])                              # (Wt, TB)

        # Hidden trunk layers (tanh).
        for i in range(1, trunk_layer):
            h = jnp.tanh(jnp.dot(wts[i - 1][...], h,
                                 precision=hp, preferred_element_type=f32)
                         + bts[i][...])

        # Fused (last trunk layer + DeepONet selector): single wide matmul.
        out_ref[...] = (jnp.dot(wf_ref[...], h,
                                precision=hp, preferred_element_type=f32)
                        + bf_ref[...])                           # (n10_pad, TB)

    return kernel


# --------------------------------------------------------------------------
# Wrapper
# --------------------------------------------------------------------------
def _pick_batch_tile(B):
    """Largest tile <= 1024 that divides B and yields a grid of >= 2 steps
    (so v7x can split the 'parallel' axis across both TensorCores)."""
    assert B % 128 == 0, "batch size must be a multiple of 128"
    for cand in (1024, 512, 256, 128):
        if B % cand == 0 and B // cand >= 2:
            return cand
    return B                                   # B == 128: single tile


def laplacian_defdifonet_forward(listU, x, params, *, F, trunk_layer,
                                 branch_layer, TB=None):
    tw, tb, ow, bw, bb, dbias = params
    n_sol = len(listU)
    B = x.shape[0]
    P = 10 * F
    n10 = 10 * n_sol
    n10_pad = ((n10 + 7) // 8) * 8             # dense sublanes for the output block
    trunk_width = tw[0].shape[1]

    if TB is None:
        TB = _pick_batch_tile(B)
    assert B % TB == 0 and TB % 128 == 0

    f32 = jnp.float32
    hp = jax.lax.Precision.HIGHEST

    # ---- Deflation branch (batch independent, tiny): plain jnp --------------
    # With n_sol~2 these matmuls use <1% of the MXU and finish in <1us; a
    # dedicated pallas_call's dispatch overhead would dominate, so XLA runs it.
    O = jnp.stack(listU, axis=0).astype(f32)                     # (n_sol, P)
    for i in range(branch_layer):
        other = jnp.dot(O, ow[i].astype(f32), precision=hp)
        s = jnp.sum(other, axis=0, keepdims=True)
        O = jnp.tanh((s - other)
                     + jnp.dot(O, bw[i].astype(f32), precision=hp)
                     + bb[i].astype(f32))
    other = jnp.dot(O, ow[-1].astype(f32), precision=hp)
    s = jnp.sum(other, axis=0, keepdims=True)
    branch_out = ((s - other)
                  + jnp.dot(O, bw[-1].astype(f32), precision=hp)
                  + bb[-1].astype(f32))                          # (n_sol, P)

    # ---- Fold branch features + LAST trunk layer into the selector ----------
    # W_allT[s*10+k, p] = branch_out[s, p] * (p // F == k)
    S_rep = ((jnp.arange(P)[None, :] // F)
             == (jnp.arange(n10) % 10)[:, None]).astype(f32)     # (n10, P)
    W_allT = jnp.repeat(branch_out, 10, axis=0) * S_rep          # (n10, P)

    db_col = jnp.tile(dbias.astype(f32), (n_sol, 1)).reshape(n10, 1)
    W_fused = jnp.dot(W_allT, tw[-1].astype(f32).T, precision=hp)            # (n10, Wt)
    b_fused = jnp.dot(W_allT, tb[-1].astype(f32).T, precision=hp) + db_col   # (n10, 1)

    pad = n10_pad - n10
    W_fused = jnp.pad(W_fused, ((0, pad), (0, 0)))               # (n10_pad, Wt)
    b_fused = jnp.pad(b_fused, ((0, pad), (0, 0)))               # (n10_pad, 1)

    # ---- Tiled trunk + DeepONet evaluation (Pallas) --------------------------
    xT = x.astype(f32).T                                         # (2, B), lane-dense
    w0T = tw[0].astype(f32).T                                    # (Wt, 2)
    c0, c1 = w0T[:, 0:1], w0T[:, 1:2]                            # (Wt, 1) each
    wts = [tw[i].astype(f32).T for i in range(1, trunk_layer)]   # hidden (Wt, Wt)
    bts = [tb[i].astype(f32).T for i in range(trunk_layer)]      # (Wt, 1)

    def c_spec(shape):
        return pl.BlockSpec(shape, lambda b: (0,) * len(shape))

    in_specs = [pl.BlockSpec((2, TB), lambda b: (0, b)),
                c_spec(c0.shape), c_spec(c1.shape)]
    in_specs += [c_spec(w.shape) for w in wts]
    in_specs += [c_spec(v.shape) for v in bts]
    in_specs += [c_spec((n10_pad, trunk_width)), c_spec((n10_pad, 1))]

    # Per-step VMEM (double-buffered inputs + output block) is well under 1 MiB
    # at these shapes.  When scaling trunk_width / TB, re-derive against v7x's
    # 32 MiB scoped / 64 MiB physical VMEM (128 MiB on v5e/v6e) and set
    # pltpu.CompilerParams(vmem_limit_bytes=...) accordingly.
    out_T = pl.pallas_call(
        make_main_kernel(trunk_layer),
        grid=(B // TB,),
        in_specs=in_specs,
        out_specs=pl.BlockSpec((n10_pad, TB), lambda b: (0, b)),
        out_shape=jax.ShapeDtypeStruct((n10_pad, B), f32),
        compiler_params=pltpu.CompilerParams(dimension_semantics=("parallel",)),
    )(xT, c0, c1, *wts, *bts, W_fused, b_fused)

    out_all = out_T[:n10].reshape(n_sol, 10, B)                  # [sol, output_k, batch]
    return out_all, branch_out


def to_module_outputs(out_all, branch_out):
    """Lazily rebuild the PyTorch forward() return structure:
    10 lists of (B, 1) arrays + list of branch-feature vectors."""
    n_sol = out_all.shape[0]
    lists = tuple([out_all[i, k, :, None] for i in range(n_sol)] for k in range(10))
    return lists + ([branch_out[i] for i in range(n_sol)],)


# --------------------------------------------------------------------------
# Pure-JAX reference (same math, no Pallas) for a correctness check.
# --------------------------------------------------------------------------
def reference_forward(listU, x, params, *, F, trunk_layer, branch_layer):
    hp = jax.lax.Precision.HIGHEST
    tw, tb, ow, bw, bb, dbias = params
    h = x
    for i in range(trunk_layer):
        h = jnp.tanh(jnp.dot(h, tw[i], precision=hp) + tb[i])
    trunk_out = jnp.dot(h, tw[-1], precision=hp) + tb[-1]

    O = jnp.stack(listU, axis=0)
    for i in range(branch_layer):
        other = jnp.dot(O, ow[i], precision=hp)
        s = other.sum(axis=0, keepdims=True)
        O = jnp.tanh((s - other) + jnp.dot(O, bw[i], precision=hp) + bb[i])
    other = jnp.dot(O, ow[-1], precision=hp)
    s = other.sum(axis=0, keepdims=True)
    O = (s - other) + jnp.dot(O, bw[-1], precision=hp) + bb[-1]

    outs = []
    for i in range(O.shape[0]):
        total = trunk_out * O[i:i + 1]
        r = total.reshape(x.shape[0], 10, F).sum(axis=-1) + dbias
        outs.append(r)
    return jnp.stack(outs, axis=0), O          # (n_sol, B, 10), (n_sol, P)


# --------------------------------------------------------------------------
# Deterministic parameter init (shapes follow the module's __init__).
# --------------------------------------------------------------------------
def init_params(key, F, trunk_layer, trunk_width, branch_layer, branch_width):
    P = 10 * F
    keys = list(jax.random.split(key, 64))
    kit = iter(keys)

    def lin_w(fan_in, fan_out):
        bound = 1.0 / (fan_in ** 0.5)
        return jax.random.uniform(next(kit), (fan_in, fan_out), jnp.float32,
                                  -bound, bound)

    def lin_b(fan_in, fan_out):
        bound = 1.0 / (fan_in ** 0.5)
        return jax.random.uniform(next(kit), (1, fan_out), jnp.float32,
                                  -bound, bound)

    # trunkNet_Lin: Linear(2,W), (trunk_layer-1)x Linear(W,W), Linear(W, P)
    trunk_dims = [(2, trunk_width)] + \
                 [(trunk_width, trunk_width)] * max(trunk_layer - 1, 0) + \
                 [(trunk_width, P)]
    tw = [lin_w(i, o) for i, o in trunk_dims]
    tb = [lin_b(i, o) for i, o in trunk_dims]

    # branch_Lin_OtherSol (bias=False) and branch_Lin (bias=True)
    branch_dims = [(P, branch_width)] + \
                  [(branch_width, branch_width)] * max(branch_layer - 1, 0) + \
                  [(branch_width, P)]
    ow = [lin_w(i, o) for i, o in branch_dims]
    bw = [lin_w(i, o) for i, o in branch_dims]
    bb = [lin_b(i, o) for i, o in branch_dims]

    # deepONet_biases: 10 x randn(1)
    dbias = jax.random.normal(next(kit), (1, 10), jnp.float32)
    return tw, tb, ow, bw, bb, dbias


if __name__ == "__main__":
    # Small, module-consistent shapes.
    B = 256                 # number of trunk query points, x: (B, 2)
    n_sol = 2               # number of solutions in listU
    F = 16                  # numBranchFeatures  -> P = 10*F = 160
    trunk_layer, trunk_width = 2, 64
    branch_layer, branch_width = 2, 64

    root = jax.random.PRNGKey(0)
    k_params, k_x, k_u = jax.random.split(root, 3)

    params = init_params(k_params, F, trunk_layer, trunk_width,
                         branch_layer, branch_width)
    x = jax.random.normal(k_x, (B, 2), jnp.float32)
    listU = [u for u in jax.random.normal(k_u, (n_sol, 10 * F), jnp.float32)]

    fwd = jax.jit(functools.partial(
        laplacian_defdifonet_forward, F=F, trunk_layer=trunk_layer,
        branch_layer=branch_layer, TB=None))
    out_all, branch_out = fwd(listU, x, params)
    jax.block_until_ready((out_all, branch_out))

    # Verify against the pure-JAX reference.
    ref_outs, ref_branch = reference_forward(
        listU, x, params, F=F, trunk_layer=trunk_layer,
        branch_layer=branch_layer)
    ref_stacked = jnp.transpose(ref_outs, (0, 2, 1))          # (n_sol, 10, B)
    assert out_all.shape == (n_sol, 10, B)
    assert jnp.allclose(out_all, ref_stacked, rtol=1e-3, atol=1e-3)
    assert jnp.allclose(branch_out, ref_branch, rtol=1e-3, atol=1e-3)

    # PyTorch-shaped API (10 lists of (B,1) + branch list), built lazily.
    module_outputs = to_module_outputs(out_all, branch_out)
    assert module_outputs[0][0].shape == (B, 1)
    assert len(module_outputs) == 11

    print("KERNEL_OK")
</pallas_src>

<mosaic_0001>
module attributes {stable_mosaic.version = 11 : i64} {
  func.func @kernel(%arg0: i32, %arg1: memref<2x128xf32, #tpu.memory_space<vmem>>, %arg2: memref<64x1xf32, #tpu.memory_space<vmem>>, %arg3: memref<64x1xf32, #tpu.memory_space<vmem>>, %arg4: memref<64x64xf32, #tpu.memory_space<vmem>>, %arg5: memref<64x1xf32, #tpu.memory_space<vmem>>, %arg6: memref<64x1xf32, #tpu.memory_space<vmem>>, %arg7: memref<24x64xf32, #tpu.memory_space<vmem>>, %arg8: memref<24x1xf32, #tpu.memory_space<vmem>>, %arg9: memref<24x128xf32, #tpu.memory_space<vmem>>) attributes {dimension_semantics = [#tpu.dimension_semantics<parallel>], iteration_bounds = array<i64: 2>, scalar_prefetch = 0 : i64, scratch_operands = 0 : i64, tpu.core_type = #tpu.core_type<tc>, window_params = [{transform_indices = @transform_0, window_bounds = array<i64: 2, 128>}, {pipeline_mode = #tpu.pipeline_mode<synchronous>, transform_indices = @transform_1, window_bounds = array<i64: 64, 1>}, {pipeline_mode = #tpu.pipeline_mode<synchronous>, transform_indices = @transform_2, window_bounds = array<i64: 64, 1>}, {pipeline_mode = #tpu.pipeline_mode<synchronous>, transform_indices = @transform_3, window_bounds = array<i64: 64, 64>}, {pipeline_mode = #tpu.pipeline_mode<synchronous>, transform_indices = @transform_4, window_bounds = array<i64: 64, 1>}, {pipeline_mode = #tpu.pipeline_mode<synchronous>, transform_indices = @transform_5, window_bounds = array<i64: 64, 1>}, {pipeline_mode = #tpu.pipeline_mode<synchronous>, transform_indices = @transform_6, window_bounds = array<i64: 24, 64>}, {pipeline_mode = #tpu.pipeline_mode<synchronous>, transform_indices = @transform_7, window_bounds = array<i64: 24, 1>}, {transform_indices = @transform_8, window_bounds = array<i64: 24, 128>}]} {
    %c0 = arith.constant 0 : index
    %c0_0 = arith.constant 0 : index
    %0 = vector.load %arg1[%c0, %c0_0] : memref<2x128xf32, #tpu.memory_space<vmem>>, vector<2x128xf32>
    %c0_1 = arith.constant 0 : index
    %c0_2 = arith.constant 0 : index
    %1 = vector.load %arg2[%c0_1, %c0_2] : memref<64x1xf32, #tpu.memory_space<vmem>>, vector<64x1xf32>
    %2 = vector.extract_strided_slice %0 {offsets = [0, 0], sizes = [1, 128], strides = [1, 1]} : vector<2x128xf32> to vector<1x128xf32>
    %3 = vector.broadcast %1 : vector<64x1xf32> to vector<64x128xf32>
    %4 = vector.broadcast %2 : vector<1x128xf32> to vector<64x128xf32>
    %5 = arith.mulf %3, %4 : vector<64x128xf32>
    %c0_3 = arith.constant 0 : index
    %c0_4 = arith.constant 0 : index
    %6 = vector.load %arg3[%c0_3, %c0_4] : memref<64x1xf32, #tpu.memory_space<vmem>>, vector<64x1xf32>
    %7 = vector.extract_strided_slice %0 {offsets = [1, 0], sizes = [1, 128], strides = [1, 1]} : vector<2x128xf32> to vector<1x128xf32>
    %8 = vector.broadcast %6 : vector<64x1xf32> to vector<64x128xf32>
    %9 = vector.broadcast %7 : vector<1x128xf32> to vector<64x128xf32>
    %10 = arith.mulf %8, %9 : vector<64x128xf32>
    %11 = arith.addf %5, %10 : vector<64x128xf32>
    %c0_5 = arith.constant 0 : index
    %c0_6 = arith.constant 0 : index
    %12 = vector.load %arg5[%c0_5, %c0_6] : memref<64x1xf32, #tpu.memory_space<vmem>>, vector<64x1xf32>
    %13 = vector.broadcast %12 : vector<64x1xf32> to vector<64x128xf32>
    %14 = arith.addf %11, %13 : vector<64x128xf32>
    %15 = math.tanh %14 : vector<64x128xf32>
    %c0_7 = arith.constant 0 : index
    %c0_8 = arith.constant 0 : index
    %16 = vector.load %arg4[%c0_7, %c0_8] : memref<64x64xf32, #tpu.memory_space<vmem>>, vector<64x64xf32>
    %cst = arith.constant dense<0.000000e+00> : vector<64x128xf32>
    %17 = tpu.matmul %16, %15, %cst {dimension_numbers = #tpu.dot_dimension_numbers<[1], [0], [0], [1], [0, 0, 1, 1], [], []>, precision = #tpu.contract_precision<fp32>} : vector<64x64xf32>, vector<64x128xf32>, vector<64x128xf32> -> vector<64x128xf32>
    %c0_9 = arith.constant 0 : index
    %c0_10 = arith.constant 0 : index
    %18 = vector.load %arg6[%c0_9, %c0_10] : memref<64x1xf32, #tpu.memory_space<vmem>>, vector<64x1xf32>
    %19 = vector.broadcast %18 : vector<64x1xf32> to vector<64x128xf32>
    %20 = arith.addf %17, %19 : vector<64x128xf32>
    %21 = math.tanh %20 : vector<64x128xf32>
    %c0_11 = arith.constant 0 : index
    %c0_12 = arith.constant 0 : index
    %22 = vector.load %arg7[%c0_11, %c0_12] : memref<24x64xf32, #tpu.memory_space<vmem>>, vector<24x64xf32>
    %cst_13 = arith.constant dense<0.000000e+00> : vector<24x128xf32>
    %23 = tpu.matmul %22, %21, %cst_13 {dimension_numbers = #tpu.dot_dimension_numbers<[1], [0], [0], [1], [0, 0, 1, 1], [], []>, precision = #tpu.contract_precision<fp32>} : vector<24x64xf32>, vector<64x128xf32>, vector<24x128xf32> -> vector<24x128xf32>
    %c0_14 = arith.constant 0 : index
    %c0_15 = arith.constant 0 : index
    %24 = vector.load %arg8[%c0_14, %c0_15] : memref<24x1xf32, #tpu.memory_space<vmem>>, vector<24x1xf32>
    %25 = vector.broadcast %24 : vector<24x1xf32> to vector<24x128xf32>
    %26 = arith.addf %23, %25 : vector<24x128xf32>
    %c0_16 = arith.constant 0 : index
    %c0_17 = arith.constant 0 : index
    %27 = vector.load %arg9[%c0_16, %c0_17] : memref<24x128xf32, #tpu.memory_space<vmem>>, vector<24x128xf32>
    tpu.vector_store %arg9[%c0_16, %c0_17], %26 {strides = array<i32>} : memref<24x128xf32, #tpu.memory_space<vmem>>, vector<24x128xf32>,
    return
  }
  func.func @transform_0(%arg0: i32) -> (i32, i32) {
    %c0_i32 = arith.constant 0 : i32
    %c0_i32_0 = arith.constant 0 : i32
    return %c0_i32, %arg0 : i32, i32
  }
  func.func @transform_1(%arg0: i32) -> (i32, i32) {
    %c0_i32 = arith.constant 0 : i32
    %c0_i32_0 = arith.constant 0 : i32
    %c0_i32_1 = arith.constant 0 : i32
    return %c0_i32, %c0_i32_0 : i32, i32
  }
  func.func @transform_2(%arg0: i32) -> (i32, i32) {
    %c0_i32 = arith.constant 0 : i32
    %c0_i32_0 = arith.constant 0 : i32
    %c0_i32_1 = arith.constant 0 : i32
    return %c0_i32, %c0_i32_0 : i32, i32
  }
  func.func @transform_3(%arg0: i32) -> (i32, i32) {
    %c0_i32 = arith.constant 0 : i32
    %c0_i32_0 = arith.constant 0 : i32
    %c0_i32_1 = arith.constant 0 : i32
    return %c0_i32, %c0_i32_0 : i32, i32
  }
  func.func @transform_4(%arg0: i32) -> (i32, i32) {
    %c0_i32 = arith.constant 0 : i32
    %c0_i32_0 = arith.constant 0 : i32
    %c0_i32_1 = arith.constant 0 : i32
    return %c0_i32, %c0_i32_0 : i32, i32
  }
  func.func @transform_5(%arg0: i32) -> (i32, i32) {
    %c0_i32 = arith.constant 0 : i32
    %c0_i32_0 = arith.constant 0 : i32
    %c0_i32_1 = arith.constant 0 : i32
    return %c0_i32, %c0_i32_0 : i32, i32
  }
  func.func @transform_6(%arg0: i32) -> (i32, i32) {
    %c0_i32 = arith.constant 0 : i32
    %c0_i32_0 = arith.constant 0 : i32
    %c0_i32_1 = arith.constant 0 : i32
    return %c0_i32, %c0_i32_0 : i32, i32
  }
  func.func @transform_7(%arg0: i32) -> (i32, i32) {
    %c0_i32 = arith.constant 0 : i32
    %c0_i32_0 = arith.constant 0 : i32
    %c0_i32_1 = arith.constant 0 : i32
    return %c0_i32, %c0_i32_0 : i32, i32
  }
  func.func @transform_8(%arg0: i32) -> (i32, i32) {
    %c0_i32 = arith.constant 0 : i32
    %c0_i32_0 = arith.constant 0 : i32
    return %c0_i32, %arg0 : i32, i32
  }
}

</mosaic_0001>

<bundles_post_ra>
// kernel: tile.8
= control target key start
LH: loop header
LB: loop body
LE: loop exit
PB: predicated region body
PF: predicated region fallthrough
CT: control target
= control target key end

     0   :  { %s22_s0 = inlined_call_operand.vmem [shape: f32[10], index: 0, kind: input, shape index: {}]   ;;  %s23_s1 = inlined_call_operand.vmem [shape: f32[2,1,1,10], index: 1, kind: output, shape index: {}]  }
   0x1   :  { %v4_v0 = vld [vmem:[%s22_s0] ss:$0 sm:$0xff] }
   0x2   :  { %5 = vst [vmem:[%s23_s1] sm:$0x3] %v4_v0 }

// kernel: laplacian_defdifonet_forward.1
= control target key start
LH: loop header
LB: loop body
LE: loop exit
PB: predicated region body
PF: predicated region fallthrough
CT: control target
= control target key end

     0   :  { %s2796_s27 = smov 0   ;;  %s2798_s28 = smov 0   ;;  %s3572_s0 = inlined_call_operand.vmem [shape: f32[2,256], index: 0, kind: input, shape index: {}]   ;;  %s3573_s1 = inlined_call_operand.vmem [shape: f32[64,1], index: 1, kind: input, shape index: {}]   ;;  %s3574_s2 = inlined_call_operand.vmem [shape: f32[64,1], index: 2, kind: input, shape index: {}]   ;;  %s3575_s3 = inlined_call_operand.vmem [shape: f32[64,64], index: 3, kind: input, shape index: {}]   ;;  %s3576_s4 = inlined_call_operand.vmem [shape: f32[64,1], index: 4, kind: input, shape index: {}]   ;;  %s3577_s5 = inlined_call_operand.vmem [shape: f32[64,1], index: 5, kind: input, shape index: {}]   ;;  %s3578_s6 = inlined_call_operand.vmem [shape: f32[24,64], index: 6, kind: input, shape index: {}]   ;;  %s3579_s7 = inlined_call_operand.vmem [shape: f32[24,1], index: 7, kind: input, shape index: {}]   ;;  %s3580_s8 = inlined_call_operand.vmem [shape: f32[24,256], index: 8, kind: output, shape index: {}]  }
   0x1   :  { %s2800_s29 = smov 0  }
   0x2 LB: > { %s2809_s30 = sadd.s32 4294967295, %s2746_s29   ;;  %s2811_s9 = sadd.s32 1, %s2746_s29   ;;  %s2746_s29 = sphi %s2800_s29, %s3584_s29   ;;  %s2742_s28 = sphi %s2798_s28, %s3583_s28   ;;  %s2738_s27 = sphi %s2796_s27, %s3582_s27  }
   0x3   : > { %s195_s10 = ssub.s32 %s2746_s29, %s2811_s9  ;;  %s198_s11 = sadd.s32 1, %s2742_s28 }
   0x4   : > { %p196_p0 = scmp.eq.s32.totalorder %s195_s10, 0  ;;  %p208_p1 = scmp.ne.s32.totalorder %s2742_s28, %s2738_s27 }
   0x5   : > { %p209_p2 = scmp.eq.s32.totalorder %s2809_s30, 1  ;;  %p2177_p3 = scmp.ge.s32.totalorder %s2746_s29, 1 }
   0x6   : > { %s2819_s12 = scalar_select %p196_p0, %s2742_s28, %s198_s11  }
   0x7   : > { %p2821_p4 = por %p209_p2, %p208_p1  ;;  %p261_p5 = scmp.lt.s32.totalorder %s2746_s29, 3 }
   0x9   : > { %p262_p6 = pnand %p2177_p3, %p261_p5 }
   0xa   : > { %p293_p7 = scmp.lt.s32.totalorder (!%p262_p6), %s2809_s30, 1  ;;  %s290_s15 = sand.u32 (!%p262_p6), 1, %s2738_s27  }
   0xb   : > { %265 = sbr.rel (%p262_p6) target bundleno = 764 (0x2fc), region = 52 }
   0xc   : > { %s2662_s16 = smul.u32 (!%p262_p6), 24, %s290_s15 }
   0xe   : > { %s292_s27 = scalar_lea.vmem (!%p262_p6), [#allocation2], %s2662_s16 }
  0x10   : > { %v305_v0 = vld [vmem:[%s3573_s1 + $0x38] sm:$0xff]  ;;  %v304_v1 = vld [vmem:[%s3573_s1 + $0x30] sm:$0xff]  ;;  %v2748_v2 = vmov 0   ;;  %v363_v5 = vld [vmem:[%s3574_s2 + $0x28] sm:$0xff]  ;;  %vm546_vm0 = vcmask 523264   ;;  %s294_s22 = scalar_select %p293_p7, %s2809_s30, 1  ;;  %v346_v43 = vlaneseq }
  0x11   : > { %2691 = vset.pattern.permute.xlu1 %v2748_v2  ;;  %2690 = vset.pattern.permute.xlu0 %v2748_v2  ;;  %v365_v3 = vld [vmem:[%s3574_s2 + $0x38] sm:$0xff]  ;;  %v364_v4 = vld [vmem:[%s3574_s2 + $0x30] sm:$0xff]  ;;  %v303_v6 = vld [vmem:[%s3573_s1 + $0x28] sm:$0xff]  ;;  %vm2750_vm1 = vmmov 0   ;;  %s2179_s17 = sshll.u32 (%p2821_p4), %s2809_s30, 3 }
  0x12   : > { %343 = vperm.xlu0 %2690, %v305_v0   ;;  %338 = vperm.xlu1 %2691, %v304_v1   ;;  %v433_v7 = vld [vmem:[%s3576_s4 + $0x38] sm:$0xff]  ;;  %v302_v8 = vld [vmem:[%s3573_s1 + $0x20] sm:$0xff]  ;;  %v432_v10 = vld [vmem:[%s3576_s4 + $0x30] sm:$0xff]  ;;  %s2178_s23 = sshll.u32 %s294_s22, 1  ;;  %v347_v44 = vshrl.u32 %v346_v43, 7  ;;  %s2081_s20 = scalar_lea.vmem (%p2821_p4), %s3580_s8, %s2179_s17 }
  0x13   : > { %v362_v9 = vld [vmem:[%s3574_s2 + $0x20] sm:$0xff]  ;;  %v361_v11 = vld [vmem:[%s3574_s2 + $0x18] sm:$0xff]  ;;  %v431_v13 = vld [vmem:[%s3576_s4 + $0x28] sm:$0xff]  ;;  %s296_s26 = scalar_lea.vmem %s3572_s0, %s2178_s23 }
  0x14   : > { %v301_v12 = vld [vmem:[%s3573_s1 + $0x18] sm:$0xff]  ;;  %v300_v14 = vld [vmem:[%s3573_s1 + $0x10] sm:$0xff]  ;;  %v430_v16 = vld [vmem:[%s3576_s4 + $0x20] sm:$0xff]  ;;  %v408_v45 = vsub.s32 1, %v347_v44  ;;  %v348_v48 = vsub.s32 0, %v347_v44 }
  0x15   : > { %v360_v15 = vld [vmem:[%s3574_s2 + $0x10] sm:$0xff]  ;;  %v359_v17 = vld [vmem:[%s3574_s2 + $0x8] sm:$0xff]  ;;  %v429_v19 = vld [vmem:[%s3576_s4 + $0x18] sm:$0xff] }
  0x16   : > { %403 = vperm.xlu0 %2690, %v365_v3   ;;  %398 = vperm.xlu1 %2691, %v364_v4   ;;  %v299_v18 = vld [vmem:[%s3573_s1 + $0x8] sm:$0xff]  ;;  %v298_v20 = vld [vmem:[%s3573_s1] sm:$0xff]  ;;  %v428_v22 = vld [vmem:[%s3576_s4 + $0x10] sm:$0xff] }
  0x17   : > { %v358_v21 = vld [vmem:[%s3574_s2] sm:$0xff]  ;;  %v427_v23 = vld [vmem:[%s3576_s4 + $0x8] sm:$0xff]  ;;  %v505_v25 = vld [vmem:[%s3577_s5 + $0x38] sm:$0xff] }
  0x18   : > { %v426_v24 = vld [vmem:[%s3576_s4] sm:$0xff]  ;;  %v504_v26 = vld [vmem:[%s3577_s5 + $0x30] sm:$0xff]  ;;  %v503_v27 = vld [vmem:[%s3577_s5 + $0x28] sm:$0xff] }
  0x19   : > { %v502_v28 = vld [vmem:[%s3577_s5 + $0x20] sm:$0xff]  ;;  %v501_v32 = vld [vmem:[%s3577_s5 + $0x18] sm:$0xff]  ;;  %v500_v33 = vld [vmem:[%s3577_s5 + $0x10] sm:$0xff] }
  0x1a   : > { %393 = vperm.xlu1 %2691, %v363_v5   ;;  %333 = vperm.xlu0 %2690, %v303_v6   ;;  %v490_v29 = vld [vmem:[%s3575_s3] sm:$0xff]  ;;  %v499_v36 = vld [vmem:[%s3577_s5 + $0x8] sm:$0xff]  ;;  %v1422_v42 = vld [vmem:[%s3579_s7 + $0x10] sm:$0xff] }
  0x1b   : > { %v548_v30 = vsel %vm546_vm0, %v490_v29, 0  ;;  %v498_v37 = vld [vmem:[%s3577_s5] sm:$0xff]  ;;  %v1421_v41 = vld [vmem:[%s3579_s7 + $0x8] sm:$0xff] }
  0x1c   : > { %v2913_v31 = vand.u32 4294901760, %v548_v30  ;;  %v1420_v40 = vld [vmem:[%s3579_s7] sm:$0xff] }
  0x1d   : > { %v297_v49 = vld [vmem:[%s296_s26] sm:$0x3] }
  0x1e   : > { %471 = vperm.xlu0 %2690, %v433_v7   ;;  %328 = vperm.xlu1 %2691, %v302_v8   ;;  %v2922_v34 = vsub.f32 %v548_v30, %v2913_v31  ;;  %v2949_v50 = vrot.slane %v297_v49, %v408_v45  ;;  %v2951_v53 = vrot.slane %v297_v49, %v348_v48  ;;  %v491_v45 = vld [vmem:[%s3575_s3 + $0x8] sm:$0xff] }
  0x1f   : > { %2388 = vmatprep.mubr.f32.mxu1 %v2913_v31 }
  0x20   : > { %v646_v35 = vand.u32 4294901760, %v2922_v34 }
  0x22   : > { %388 = vperm.xlu0 %2690, %v362_v9   ;;  %466 = vperm.xlu1 %2691, %v432_v10   ;;  %v647_v38 = vsub.f32 %v2922_v34, %v646_v35 }
  0x24   : > { %v648_v39 = vand.u32 4294901760, %v647_v38 }
  0x26   : > { %383 = vperm.xlu1 %2691, %v361_v11   ;;  %323 = vperm.xlu0 %2690, %v301_v12  }
  0x27   : > { %2360 = vmatprep.mubr.f32.mxu0 %v648_v39 }
  0x2a   : > { %461 = vperm.xlu0 %2690, %v431_v13   ;;  %318 = vperm.xlu1 %2691, %v300_v14  }
  0x2e   : > { %378 = vperm.xlu0 %2690, %v360_v15   ;;  %456 = vperm.xlu1 %2691, %v430_v16  }
  0x32   : > { %373 = vperm.xlu1 %2691, %v359_v17   ;;  %313 = vperm.xlu0 %2690, %v299_v18  }
  0x36   : > { %451 = vperm.xlu0 %2690, %v429_v19   ;;  %308 = vperm.xlu1 %2691, %v298_v20  }
  0x3a   : > { %368 = vperm.xlu0 %2690, %v358_v21   ;;  %446 = vperm.xlu1 %2691, %v428_v22  }
  0x3e   : > { %441 = vperm.xlu0 %2690, %v427_v23   ;;  %436 = vperm.xlu1 %2691, %v426_v24  }
  0x42   : > { %543 = vperm.xlu0 %2690, %v505_v25   ;;  %538 = vperm.xlu1 %2691, %v504_v26  }
  0x46   : > { %533 = vperm.xlu0 %2690, %v503_v27   ;;  %528 = vperm.xlu1 %2691, %v502_v28  }
  0x4a   : > { %523 = vperm.xlu0 %2690, %v501_v32   ;;  %518 = vperm.xlu1 %2691, %v500_v33  }
  0x4e   : > { %513 = vperm.xlu0 %2690, %v499_v36   ;;  %508 = vperm.xlu1 %2691, %v498_v37  }
  0x52   : > { %1425 = vperm.xlu0 %2690, %v1420_v40   ;;  %1430 = vperm.xlu1 %2691, %v1421_v41  }
  0x56   : > { %1435 = vperm.xlu0 %2690, %v1422_v42  }
  0x8d   : > { %v344_v46 = vpop.permute.xlu0 %343  ;;  %v339_v47 = vpop.permute.xlu1 %338 }
  0x8e   : > { %v357_v57 = vmul.f32 %v2951_v53, %v344_v46  ;;  %v356_v62 = vmul.f32 %v2951_v53, %v339_v47 }
  0x91   : > { %v404_v51 = vpop.permute.xlu0 %403  ;;  %v399_v52 = vpop.permute.xlu1 %398 }
  0x92   : > { %v417_v54 = vmul.f32 %v2949_v50, %v404_v51  ;;  %v416_v58 = vmul.f32 %v2949_v50, %v399_v52 }
  0x94   : > { %v425_v59 = vadd.f32 %v417_v54, %v357_v57  ;;  %v424_v0 = vadd.f32 %v416_v58, %v356_v62  ;;  %v551_v57 = vsel %vm546_vm0, %v491_v45, 0 }
  0x95   : > { %v394_v55 = vpop.permute.xlu1 %393  ;;  %v334_v56 = vpop.permute.xlu0 %333 }
  0x96   : > { %v415_v4 = vmul.f32 %v2949_v50, %v394_v55  ;;  %v355_v5 = vmul.f32 %v2951_v53, %v334_v56  ;;  %v492_v56 = vld [vmem:[%s3575_s3 + $0x10] sm:$0xff] }
  0x97   : > { %v554_v62 = vsel %vm546_vm0, %v492_v56, 0 }
  0x98   : > { %v423_v9 = vadd.f32 %v415_v4, %v355_v5  ;;  %v493_v4 = vld [vmem:[%s3575_s3 + $0x18] sm:$0xff] }
  0x99   : > { %v472_v60 = vpop.permute.xlu0 %471  ;;  %v329_v61 = vpop.permute.xlu1 %328 }
  0x9a   : > { %v481_v63 = vadd.f32 %v472_v60, %v425_v59  ;;  %v354_v12 = vmul.f32 %v2951_v53, %v329_v61 }
  0x9c   : > { %2692 = vtanh.f32 %v481_v63 }
  0x9d   : > { %v389_v1 = vpop.permute.xlu0 %388  ;;  %v467_v2 = vpop.permute.xlu1 %466 }
  0x9e   : > { %v480_v3 = vadd.f32 %v467_v2, %v424_v0  ;;  %v414_v8 = vmul.f32 %v2949_v50, %v389_v1 }
  0xa0   : > { %2694 = vtanh.f32 %v480_v3  ;;  %v422_v14 = vadd.f32 %v414_v8, %v354_v12  ;;  %v3013_v3 = vand.u32 4294901760, %v551_v57 }
  0xa1   : > { %v384_v6 = vpop.permute.xlu1 %383  ;;  %v324_v7 = vpop.permute.xlu0 %323 }
  0xa2   : > { %v413_v20 = vmul.f32 %v2949_v50, %v384_v6  ;;  %v353_v21 = vmul.f32 %v2951_v53, %v324_v7  ;;  %v3025_v7 = vand.u32 4294901760, %v554_v62  ;;  %v3035_v12 = vsub.f32 %v551_v57, %v3013_v3 }
  0xa4   : > { %v421_v29 = vadd.f32 %v413_v20, %v353_v21 }
  0xa5   : > { %v462_v10 = vpop.permute.xlu0 %461  ;;  %v319_v11 = vpop.permute.xlu1 %318 }
  0xa6   : > { %v479_v13 = vadd.f32 %v462_v10, %v423_v9  ;;  %v352_v33 = vmul.f32 %v2951_v53, %v319_v11  ;;  %v557_v10 = vsel %vm546_vm0, %v493_v4, 0  ;;  %v494_v11 = vld [vmem:[%s3575_s3 + $0x20] sm:$0xff] }
  0xa8   : > { %2696 = vtanh.f32 %v479_v13 }
  0xa9   : > { %v2693_v15 = vpop.eup %2692  ;;  %v379_v16 = vpop.permute.xlu0 %378 }
  0xaa   : > { %v457_v17 = vpop.permute.xlu1 %456  ;;  %v2961_v18 = vand.u32 4294901760, %v2693_v15  ;;  %v412_v28 = vmul.f32 %v2949_v50, %v379_v16  ;;  %v3043_v16 = vsub.f32 %v554_v62, %v3025_v7 }
  0xab   : > { %v478_v19 = vadd.f32 %v457_v17, %v422_v14  ;;  %v495_v14 = vld [vmem:[%s3575_s3 + $0x28] sm:$0xff]  ;;  %v3045_v17 = vand.u32 4294901760, %v557_v10 }
  0xac   : > { %2344 = vmatprep.subr.mxu0 %v2961_v18  ;;  %v2967_v22 = vsub.f32 %v2693_v15, %v2961_v18  ;;  %v420_v41 = vadd.f32 %v412_v28, %v352_v33  ;;  %v666_v33 = vand.u32 4294901760, %v3043_v16 }
  0xad   : > { %2698 = vtanh.f32 %v478_v19  ;;  %v2695_v23 = vpop.eup %2694  ;;  %v314_v25 = vpop.permute.xlu0 %313  ;;  %2345 = vmatpush3.msra.mxu0 %v2961_v18  ;;  %v560_v19 = vsel %vm546_vm0, %v494_v11, 0 }
  0xae   : > { %v374_v24 = vpop.permute.xlu1 %373  ;;  %v2970_v26 = vand.u32 4294901760, %v2695_v23  ;;  %v2973_v27 = vand.u32 4294901760, %v2967_v22  ;;  %v351_v43 = vmul.f32 %v2951_v53, %v314_v25  ;;  %v496_v25 = vld [vmem:[%s3575_s3 + $0x30] sm:$0xff] }
  0xaf   : > { %v411_v42 = vmul.f32 %v2949_v50, %v374_v24  ;;  %v563_v24 = vsel %vm546_vm0, %v495_v14, 0 }
  0xb0   : > { %2346 = vmatprep.subr.mxu0 %v2970_v26  ;;  %v744_v30 = vsub.f32 %v2967_v22, %v2973_v27  ;;  %v2980_v32 = vsub.f32 %v2695_v23, %v2970_v26  ;;  %v656_v23 = vand.u32 4294901760, %v3035_v12 }
  0xb1   : > { %v452_v36 = vpop.permute.xlu0 %451  ;;  %2347 = vmatpush3.msra.mxu0 %v2970_v26 }
  0xb2   : > { %v309_v37 = vpop.permute.xlu1 %308  ;;  %v477_v38 = vadd.f32 %v452_v36, %v421_v29  ;;  %v745_v39 = vand.u32 4294901760, %v744_v30  ;;  %v2985_v40 = vand.u32 4294901760, %v2980_v32  ;;  %v3059_v29 = vand.u32 4294901760, %v560_v19 }
  0xb3   : > { %v350_v47 = vmul.f32 %v2951_v53, %v309_v37  ;;  %v419_v53 = vadd.f32 %v411_v42, %v351_v43  ;;  %v3064_v36 = vsub.f32 %v557_v10, %v3045_v17  ;;  %v497_v37 = vld [vmem:[%s3575_s3 + $0x38] sm:$0xff]  ;;  %v566_v42 = vsel %vm546_vm0, %v496_v25, 0 }
  0xb4   : > { %2700 = vtanh.f32 %v477_v38  ;;  %2372 = vmatprep.subr.mxu1 %v745_v39  ;;  %v751_v44 = vsub.f32 %v2980_v32, %v2985_v40  ;;  %v657_v43 = vsub.f32 %v3035_v12, %v656_v23 }
  0xb5   : > { %v2697_v46 = vpop.eup %2696  ;;  %v369_v48 = vpop.permute.xlu0 %368  ;;  %2373 = vmatpush3.msra.mxu1 %v745_v39 }
  0xb6   : > { %v447_v49 = vpop.permute.xlu1 %446  ;;  %v2995_v51 = vand.u32 4294901760, %v2697_v46  ;;  %v410_v52 = vmul.f32 %v2949_v50, %v369_v48  ;;  %v752_v55 = vand.u32 4294901760, %v751_v44 }
  0xb7   : > { %v476_v54 = vadd.f32 %v447_v49, %v420_v41  ;;  %v3074_v41 = vand.u32 4294901760, %v563_v24  ;;  %v667_v49 = vsub.f32 %v3043_v16, %v666_v33 }
  0xb8   : > { %2348 = vmatprep.subr.mxu0 %v2995_v51  ;;  %2374 = vmatprep.subr.mxu1 %v752_v55  ;;  %v418_v58 = vadd.f32 %v410_v52, %v350_v47  ;;  %v3004_v59 = vsub.f32 %v2697_v46, %v2995_v51  ;;  %v3087_v46 = vsub.f32 %v560_v19, %v3059_v29  ;;  %v569_v47 = vsel %vm546_vm0, %v497_v37, 0 }
  0xb9   : > { %2702 = vtanh.f32 %v476_v54  ;;  %v442_v61 = vpop.permute.xlu0 %441  ;;  %2349 = vmatpush3.msra.mxu0 %v2995_v51  ;;  %2375 = vmatpush3.msra.mxu1 %v752_v55  ;;  %v676_v52 = vand.u32 4294901760, %v3064_v36  ;;  %v3095_v54 = vand.u32 4294901760, %v566_v42  ;;  %v668_v11 = vand.u32 4294901760, %v667_v49 }
  0xba   : > { %v2699_v60 = vpop.eup %2698  ;;  %v437_v50 = vpop.permute.xlu1 %436  ;;  %v475_v0 = vadd.f32 %v442_v61, %v419_v53  ;;  %v3011_v2 = vand.u32 4294901760, %v3004_v59  ;;  %v3107_v61 = vand.u32 4294901760, %v569_v47 }
  0xbb   : > { %v3008_v63 = vand.u32 4294901760, %v2699_v60  ;;  %v474_v1 = vadd.f32 %v437_v50, %v418_v58  ;;  %v3103_v58 = vsub.f32 %v563_v24, %v3074_v41  ;;  %v658_v50 = vand.u32 4294901760, %v657_v43 }
  0xbc   : > { %2704 = vtanh.f32 %v475_v0  ;;  %v758_v5 = vsub.f32 %v3004_v59, %v3011_v2  ;;  %v677_v4 = vsub.f32 %v3064_v36, %v676_v52  ;;  %v3136_v19 = vsub.f32 %v569_v47, %v3107_v61 }
  0xbd   : > { %2350 = vmatprep.subr.mxu0 %v3008_v63  ;;  %v3022_v6 = vsub.f32 %v2699_v60, %v3008_v63  ;;  %2706 = vtanh.f32 %v474_v1  ;;  %v686_v1 = vand.u32 4294901760, %v3087_v46  ;;  %v696_v14 = vand.u32 4294901760, %v3103_v58 }
  0xbe   : > { %2351 = vmatpush3.msra.mxu0 %v3008_v63  ;;  %v759_v8 = vand.u32 4294901760, %v758_v5  ;;  %v678_v25 = vand.u32 4294901760, %v677_v4 }
  0xbf   : > { %v3028_v9 = vand.u32 4294901760, %v3022_v6  ;;  %v687_v24 = vsub.f32 %v3087_v46, %v686_v1  ;;  %v697_v43 = vsub.f32 %v3103_v58, %v696_v14 }
  0xc0   : > { %2376 = vmatprep.subr.mxu1 %v759_v8 }
  0xc1   : > { %v765_v13 = vsub.f32 %v3022_v6, %v3028_v9  ;;  %v2701_v15 = vpop.eup %2700  ;;  %2377 = vmatpush3.msra.mxu1 %v759_v8  ;;  %v3124_v8 = vsub.f32 %v566_v42, %v3095_v54  ;;  %v688_v47 = vand.u32 4294901760, %v687_v24  ;;  %v698_v49 = vand.u32 4294901760, %v697_v43 }
  0xc2   : > { %v3048_v20 = vand.u32 4294901760, %v2701_v15 }
  0xc3   : > { %v766_v21 = vand.u32 4294901760, %v765_v13  ;;  %v706_v37 = vand.u32 4294901760, %v3124_v8 }
  0xc4   : > { %2352 = vmatprep.subr.mxu0 %v3048_v20  ;;  %v3057_v28 = vsub.f32 %v2701_v15, %v3048_v20 }
  0xc5   : > { %2378 = vmatprep.subr.mxu1 %v766_v21  ;;  %2353 = vmatpush3.msra.mxu0 %v3048_v20 }
  0xc6   : > { %v2703_v30 = vpop.eup %2702  ;;  %2379 = vmatpush3.msra.mxu1 %v766_v21  ;;  %v3072_v39 = vand.u32 4294901760, %v3057_v28 }
  0xc7   : > { %v3069_v38 = vand.u32 4294901760, %v2703_v30 }
  0xc8   : > { %v772_v44 = vsub.f32 %v3057_v28, %v3072_v39 }
  0xc9   : > { %2354 = vmatprep.subr.mxu0 %v3069_v38  ;;  %v3084_v45 = vsub.f32 %v2703_v30, %v3069_v38  ;;  %v2705_v48 = vpop.eup %2704 }
  0xca   : > { %2355 = vmatpush3.msra.mxu0 %v3069_v38  ;;  %v2707_v55 = vpop.eup %2706  ;;  %v3097_v56 = vand.u32 4294901760, %v2705_v48  ;;  %v773_v57 = vand.u32 4294901760, %v772_v44  ;;  %v716_v44 = vand.u32 4294901760, %v3136_v19 }
  0xcb   : > { %v3100_v53 = vand.u32 4294901760, %v3084_v45  ;;  %v3105_v60 = vand.u32 4294901760, %v2707_v55 }
  0xcc   : > { %2356 = vmatprep.subr.mxu0 %v3097_v56  ;;  %2380 = vmatprep.subr.mxu1 %v773_v57  ;;  %v3113_v0 = vsub.f32 %v2705_v48, %v3097_v56 }
  0xcd   : > { %v779_v62 = vsub.f32 %v3084_v45, %v3100_v53  ;;  %2357 = vmatpush3.msra.mxu0 %v3097_v56  ;;  %2381 = vmatpush3.msra.mxu1 %v773_v57  ;;  %v3121_v5 = vsub.f32 %v2707_v55, %v3105_v60 }
  0xce   : > { %2358 = vmatprep.subr.mxu0 %v3105_v60  ;;  %v3128_v13 = vand.u32 4294901760, %v3113_v0 }
  0xcf   : > { %v780_v10 = vand.u32 4294901760, %v779_v62  ;;  %2359 = vmatpush3.msra.mxu0 %v3105_v60  ;;  %v3133_v15 = vand.u32 4294901760, %v3121_v5 }
  0xd0   : > { %2361 = vmatmul.mubr.f32.vlgmr.msra.gmra.mxu0 %v658_v50  ;;  %v786_v21 = vsub.f32 %v3113_v0, %v3128_v13  ;;  %2400 = vmatprep.subr.mxu0 %v2967_v22 }
  0xd1   : > { %2382 = vmatprep.subr.mxu1 %v780_v10  ;;  %v793_v30 = vsub.f32 %v3121_v5, %v3133_v15  ;;  %2401 = vmatpush3.msra.mxu0 %v2967_v22  ;;  %v707_v22 = vsub.f32 %v3124_v8, %v706_v37 }
  0xd2   : > { %2383 = vmatpush3.msra.mxu1 %v780_v10  ;;  %2363 = vmatprep.mubr.f32.mxu0 %v668_v11  ;;  %v787_v42 = vand.u32 4294901760, %v786_v21 }
  0xd3   : > { %2402 = vmatprep.subr.mxu0 %v2980_v32  ;;  %v794_v48 = vand.u32 4294901760, %v793_v30  ;;  %v708_v55 = vand.u32 4294901760, %v707_v22 }
  0xd4   : > { %2403 = vmatpush3.msra.mxu0 %v2980_v32  ;;  %2384 = vmatprep.subr.mxu1 %v787_v42  ;;  %v717_v32 = vsub.f32 %v3136_v19, %v716_v44 }
  0xd5   : > { %2364 = vmatmul.mubr.f32.gmra.mxu0 %v678_v25  ;;  %2404 = vmatprep.subr.mxu0 %v3004_v59 }
  0xd6   : > { %2385 = vmatpush3.msra.mxu1 %v787_v42  ;;  %2405 = vmatpush3.msra.mxu0 %v3004_v59  ;;  %v718_v59 = vand.u32 4294901760, %v717_v32 }
  0xd7   : > { %2386 = vmatprep.subr.mxu1 %v794_v48  ;;  %2406 = vmatprep.subr.mxu0 %v3022_v6 }
  0xd8   : > { %2366 = vmatprep.mubr.f32.mxu0 %v688_v47  ;;  %2387 = vmatpush3.msra.mxu1 %v794_v48 }
  0xd9   : > { %2407 = vmatpush3.msra.mxu0 %v3022_v6  ;;  %2389 = vmatmul.mubr.f32.vlgmr.msra.gmra.mxu1 %v3013_v3 }
  0xda   : > { %2367 = vmatmul.mubr.f32.gmra.mxu0 %v698_v49  ;;  %2408 = vmatprep.subr.mxu0 %v3057_v28 }
  0xdb   : > { %2428 = vmatprep.subr.mxu1 %v2961_v18  ;;  %2409 = vmatpush3.msra.mxu0 %v3057_v28 }
  0xdc   : > { %2429 = vmatpush3.msra.mxu1 %v2961_v18  ;;  %2410 = vmatprep.subr.mxu0 %v3084_v45 }
  0xdd   : > { %2430 = vmatprep.subr.mxu1 %v2970_v26  ;;  %2369 = vmatprep.mubr.f32.mxu0 %v708_v55 }
  0xde   : > { %2391 = vmatprep.mubr.f32.mxu1 %v3025_v7  ;;  %2411 = vmatpush3.msra.mxu0 %v3084_v45 }
  0xdf   : > { %2431 = vmatpush3.msra.mxu1 %v2970_v26  ;;  %2370 = vmatmul.mubr.f32.gmra.mxu0 %v718_v59 }
  0xe0   : > { %2392 = vmatmul.mubr.f32.gmra.mxu1 %v3045_v17  ;;  %2412 = vmatprep.subr.mxu0 %v3113_v0 }
  0xe1   : > { %2432 = vmatprep.subr.mxu1 %v2995_v51  ;;  %2413 = vmatpush3.msra.mxu0 %v3113_v0 }
  0xe2   : > { %2433 = vmatpush3.msra.mxu1 %v2995_v51  ;;  %2414 = vmatprep.subr.mxu0 %v3121_v5 }
  0xe3   : > { %2434 = vmatprep.subr.mxu1 %v3008_v63  ;;  %2394 = vmatprep.mubr.f32.mxu1 %v3059_v29 }
  0xe4   : > { %2415 = vmatpush3.msra.mxu0 %v3121_v5  ;;  %2416 = vmatprep.mubr.f32.mxu0 %v2922_v34 }
  0xe5   : > { %2435 = vmatpush3.msra.mxu1 %v3008_v63  ;;  %2417 = vmatmul.mubr.f32.vlgmr.msra.gmra.mxu0 %v3035_v12 }
  0xe6   : > { %2395 = vmatmul.mubr.f32.gmra.mxu1 %v3074_v41  ;;  %2436 = vmatprep.subr.mxu1 %v3048_v20 }
  0xe7   : > { %2456 = vmatprep.subr.mxu0 %v2973_v27  ;;  %2437 = vmatpush3.msra.mxu1 %v3048_v20 }
  0xe8   : > { %2457 = vmatpush3.msra.mxu0 %v2973_v27  ;;  %2438 = vmatprep.subr.mxu1 %v3069_v38 }
  0xe9   : > { %2458 = vmatprep.subr.mxu0 %v2985_v40  ;;  %2397 = vmatprep.mubr.f32.mxu1 %v3095_v54 }
  0xea   : > { %2419 = vmatprep.mubr.f32.mxu0 %v3043_v16  ;;  %2439 = vmatpush3.msra.mxu1 %v3069_v38 }
  0xeb   : > { %2459 = vmatpush3.msra.mxu0 %v2985_v40  ;;  %2398 = vmatmul.mubr.f32.gmra.mxu1 %v3107_v61 }
  0xec   : > { %2420 = vmatmul.mubr.f32.gmra.mxu0 %v3064_v36  ;;  %2440 = vmatprep.subr.mxu1 %v3097_v56 }
  0xed   : > { %2460 = vmatprep.subr.mxu0 %v3011_v2  ;;  %2441 = vmatpush3.msra.mxu1 %v3097_v56 }
  0xee   : > { %2461 = vmatpush3.msra.mxu0 %v3011_v2  ;;  %2442 = vmatprep.subr.mxu1 %v3105_v60 }
  0xef   : > { %2462 = vmatprep.subr.mxu0 %v3028_v9  ;;  %2422 = vmatprep.mubr.f32.mxu0 %v3087_v46 }
  0xf0   : > { %2443 = vmatpush3.msra.mxu1 %v3105_v60  ;;  %2444 = vmatprep.mubr.f32.mxu1 %v646_v35 }
  0xf1   : > { %2463 = vmatpush3.msra.mxu0 %v3028_v9  ;;  %2445 = vmatmul.mubr.f32.vlgmr.msra.gmra.mxu1 %v656_v23 }
  0xf2   : > { %2423 = vmatmul.mubr.f32.gmra.mxu0 %v3103_v58  ;;  %2464 = vmatprep.subr.mxu0 %v3072_v39 }
  0xf3   : > { %2484 = vmatprep.subr.mxu1 %v2961_v18  ;;  %2465 = vmatpush3.msra.mxu0 %v3072_v39 }
  0xf4   : > { %2485 = vmatpush3.msra.mxu1 %v2961_v18  ;;  %2466 = vmatprep.subr.mxu0 %v3100_v53 }
  0xf5   : > { %2486 = vmatprep.subr.mxu1 %v2970_v26  ;;  %2425 = vmatprep.mubr.f32.mxu0 %v3124_v8 }
  0xf6   : > { %2447 = vmatprep.mubr.f32.mxu1 %v666_v33  ;;  %2467 = vmatpush3.msra.mxu0 %v3100_v53 }
  0xf7   : > { %2487 = vmatpush3.msra.mxu1 %v2970_v26  ;;  %2426 = vmatmul.mubr.f32.gmra.mxu0 %v3136_v19 }
  0xf8   : > { %2448 = vmatmul.mubr.f32.gmra.mxu1 %v676_v52  ;;  %2468 = vmatprep.subr.mxu0 %v3128_v13  ;;  %v539_v52 = vpop.permute.xlu1 %538 }
  0xf9   : > { %2488 = vmatprep.subr.mxu1 %v2995_v51  ;;  %2469 = vmatpush3.msra.mxu0 %v3128_v13 }
  0xfa   : > { %2489 = vmatpush3.msra.mxu1 %v2995_v51  ;;  %2470 = vmatprep.subr.mxu0 %v3133_v15 }
  0xfb   : > { %2490 = vmatprep.subr.mxu1 %v3008_v63  ;;  %2450 = vmatprep.mubr.f32.mxu1 %v686_v1 }
  0xfc   : > { %2471 = vmatpush3.msra.mxu0 %v3133_v15  ;;  %2472 = vmatprep.mubr.f32.mxu0 %v2913_v31 }
  0xfd   : > { %2491 = vmatpush3.msra.mxu1 %v3008_v63  ;;  %2473 = vmatmul.mubr.f32.vlgmr.msra.gmra.mxu0 %v3013_v3 }
  0xfe   : > { %2451 = vmatmul.mubr.f32.gmra.mxu1 %v696_v14  ;;  %2492 = vmatprep.subr.mxu1 %v3048_v20 }
  0xff   : > { %2493 = vmatpush3.msra.mxu1 %v3048_v20  ;;  %2453 = vmatprep.mubr.f32.mxu1 %v706_v37 }
 0x100   : > { %2494 = vmatprep.subr.mxu1 %v3069_v38  ;;  %2475 = vmatprep.mubr.f32.mxu0 %v3025_v7 }
 0x101   : > { %2495 = vmatpush3.msra.mxu1 %v3069_v38  ;;  %2476 = vmatmul.mubr.f32.gmra.mxu0 %v3045_v17 }
 0x102   : > { %2454 = vmatmul.mubr.f32.gmra.mxu1 %v716_v44  ;;  %2496 = vmatprep.subr.mxu1 %v3097_v56 }
 0x103   : > { %2497 = vmatpush3.msra.mxu1 %v3097_v56  ;;  %2478 = vmatprep.mubr.f32.mxu0 %v3059_v29 }
 0x104   : > { %2498 = vmatprep.subr.mxu1 %v3105_v60  ;;  %2500 = vmatprep.mubr.f32.mxu1 %v2913_v31  ;;  %v2749_v31 = vmov 0.0  }
 0x105   : > { %2499 = vmatpush3.msra.mxu1 %v3105_v60  ;;  %2479 = vmatmul.mubr.f32.gmra.mxu0 %v3074_v41  ;;  %v529_v60 = vpop.permute.xlu1 %528 }
 0x106   : > { %2501 = vmatmul.mubr.f32.vlgmr.msra.gmra.mxu1 %v3013_v3  ;;  %2481 = vmatprep.mubr.f32.mxu0 %v3095_v54 }
 0x107   : > { %2503 = vmatprep.mubr.f32.mxu1 %v3025_v7  ;;  %2512 = vmatprep.subr.mxu0 %v2749_v31 }
 0x108   : > { %2537 = vmatprep.subr.mxu1 %v2749_v31 }
 0x109   : > { %2482 = vmatmul.mubr.f32.gmra.mxu0 %v3107_v61  ;;  %v519_v10 = vpop.permute.xlu1 %518 }
 0x10a   : > { %2504 = vmatmul.mubr.f32.gmra.mxu1 %v3045_v17  ;;  %2528 = vmatprep.mubr.msk.f32.mxu0 %vm2750_vm1, %v2749_v31 }
 0x10b   : > { %2506 = vmatprep.mubr.f32.mxu1 %v3059_v29 }
 0x10d   : > { %v509_v55 = vpop.permute.xlu1 %508 }
 0x10e   : > { %2507 = vmatmul.mubr.f32.gmra.mxu1 %v3074_v41  ;;  %v544_v41 = vpop.permute.xlu0 %543 }
 0x10f   : > { %2509 = vmatprep.mubr.f32.mxu1 %v3095_v54 }
 0x112   : > { %2510 = vmatmul.mubr.f32.gmra.mxu1 %v3107_v61  ;;  %v534_v57 = vpop.permute.xlu0 %533 }
 0x113   : > { %2553 = vmatprep.mubr.msk.f32.mxu1 %vm2750_vm1, %v2749_v31 }
 0x116   : > { %v524_v1 = vpop.permute.xlu0 %523 }
 0x11a   : > { %v514_v42 = vpop.permute.xlu0 %513 }
 0x190   : > { %v2362_v34 = vpop.f32.mrf.mxu0 }
 0x191   : > { %v661_v48 = vadd.f32 %v2362_v34, %v514_v42 }
 0x192   : > { %v3273_v35 = vpop.f32.mrf.mxu0 }
 0x195   : > { %v2365_v18 = vpop.f32.mrf.mxu0 }
 0x196   : > { %v681_v5 = vadd.f32 %v2365_v18, %v524_v1 }
 0x197   : > { %v670_v26 = vpop.f32.mrf.mxu0 }
 0x198   : > { %v671_v24 = vadd.f32 %v670_v26, %v519_v10 }
 0x199   : > { %v3275_v27 = vpop.f32.mrf.mxu1 }
 0x19a   : > { %v2368_v40 = vpop.f32.mrf.mxu0  ;;  %v838_v26 = vadd.f32 %v3275_v27, %v661_v48 }
 0x19b   : > { %v3277_v63 = vpop.f32.mrf.mxu1  ;;  %v701_v11 = vadd.f32 %v2368_v40, %v534_v57 }
 0x19c   : > { %v690_v51 = vpop.f32.mrf.mxu0 }
 0x19d   : > { %v691_v19 = vadd.f32 %v690_v51, %v529_v60  ;;  %v651_v51 = vadd.f32 %v3273_v35, %v509_v55 }
 0x19f   : > { %v2371_v2 = vpop.f32.mrf.mxu0 }
 0x1a0   : > { %v2393_v3 = vpop.f32.mrf.mxu1  ;;  %v721_v43 = vadd.f32 %v2371_v2, %v544_v41 }
 0x1a1   : > { %v710_v6 = vpop.f32.mrf.mxu0  ;;  %v850_v14 = vadd.f32 %v2393_v3, %v681_v5 }
 0x1a2   : > { %v843_v7 = vpop.f32.mrf.mxu1  ;;  %v711_v59 = vadd.f32 %v710_v6, %v539_v52 }
 0x1a3   : > { %v844_v22 = vadd.f32 %v843_v7, %v671_v24  ;;  %v832_v7 = vadd.f32 %v3277_v63, %v651_v51 }
 0x1a5   : > { %v3279_v9 = vpop.f32.mrf.mxu0 }
 0x1a6   : > { %v2396_v12 = vpop.f32.mrf.mxu1  ;;  %v969_v41 = vadd.f32 %v3279_v9, %v838_v26 }
 0x1a7   : > { %v3281_v17 = vpop.f32.mrf.mxu0  ;;  %v862_v21 = vadd.f32 %v2396_v12, %v701_v11 }
 0x1a8   : > { %v855_v16 = vpop.f32.mrf.mxu1  ;;  %v962_v27 = vadd.f32 %v3281_v17, %v832_v7 }
 0x1a9   : > { %v856_v44 = vadd.f32 %v855_v16, %v691_v19 }
 0x1ab   : > { %v2399_v20 = vpop.f32.mrf.mxu1 }
 0x1ac   : > { %v2421_v23 = vpop.f32.mrf.mxu0  ;;  %v874_v18 = vadd.f32 %v2399_v20, %v721_v43 }
 0x1ad   : > { %v867_v28 = vpop.f32.mrf.mxu1  ;;  %v983_v25 = vadd.f32 %v2421_v23, %v850_v14 }
 0x1ae   : > { %v975_v29 = vpop.f32.mrf.mxu0  ;;  %v868_v2 = vadd.f32 %v867_v28, %v711_v59 }
 0x1af   : > { %v976_v12 = vadd.f32 %v975_v29, %v844_v22 }
 0x1b1   : > { %v3283_v33 = vpop.f32.mrf.mxu1 }
 0x1b2   : > { %v2424_v36 = vpop.f32.mrf.mxu0  ;;  %v1100_v29 = vadd.f32 %v3283_v33, %v969_v41 }
 0x1b3   : > { %v3285_v39 = vpop.f32.mrf.mxu1  ;;  %v997_v47 = vadd.f32 %v2424_v36, %v862_v21 }
 0x1b4   : > { %v989_v38 = vpop.f32.mrf.mxu0  ;;  %v1092_v9 = vadd.f32 %v3285_v39, %v962_v27  ;;  %v1417_v39 = vld [vmem:[%s3578_s6] sm:$0xff] }
 0x1b5   : > { %v990_v40 = vadd.f32 %v989_v38, %v856_v44 }
 0x1b7   : > { %v2427_v45 = vpop.f32.mrf.mxu0 }
 0x1b8   : > { %v2449_v46 = vpop.f32.mrf.mxu1  ;;  %v1011_v16 = vadd.f32 %v2427_v45, %v874_v18 }
 0x1b9   : > { %v1003_v54 = vpop.f32.mrf.mxu0  ;;  %v1116_v49 = vadd.f32 %v2449_v46, %v983_v25 }
 0x1ba   : > { %v1107_v56 = vpop.f32.mrf.mxu1  ;;  %v1004_v46 = vadd.f32 %v1003_v54, %v868_v2 }
 0x1bb   : > { %v1108_v6 = vadd.f32 %v1107_v56, %v976_v12 }
 0x1bd   : > { %v3287_v53 = vpop.f32.mrf.mxu0 }
 0x1be   : > { %v2452_v58 = vpop.f32.mrf.mxu1  ;;  %v1249_v56 = vadd.f32 %v3287_v53, %v1100_v29  ;;  %v1439_v53 = vsel %vm546_vm0, %v1417_v39, 0 }
 0x1bf   : > { %v3289_v61 = vpop.f32.mrf.mxu0  ;;  %v1132_v3 = vadd.f32 %v2452_v58, %v997_v47  ;;  %v3309_v21 = vand.u32 4294901760, %v1439_v53  ;;  %v1419_v47 = vld [vmem:[%s3578_s6 + $0x10] sm:$0xff] }
 0x1c0   : > { %v1123_v50 = vpop.f32.mrf.mxu1  ;;  %v1243_v17 = vadd.f32 %v3289_v61, %v1092_v9  ;;  %v1418_v61 = vld [vmem:[%s3578_s6 + $0x8] sm:$0xff] }
 0x1c1   : > { %v2477_v62 = vpop.f32.mrf.mxu0  ;;  %v1124_v36 = vadd.f32 %v1123_v50, %v990_v40  ;;  %v3325_v22 = vsub.f32 %v1439_v53, %v3309_v21 }
 0x1c2   : > { %v2455_v0 = vpop.f32.mrf.mxu1  ;;  %v1261_v23 = vadd.f32 %v2477_v62, %v1116_v49 }
 0x1c3   : > { %v1254_v4 = vpop.f32.mrf.mxu0  ;;  %v1148_v52 = vadd.f32 %v2455_v0, %v1011_v16  ;;  %v1522_v2 = vand.u32 4294901760, %v3325_v22 }
 0x1c4   : > { %v1139_v8 = vpop.f32.mrf.mxu1  ;;  %v1255_v62 = vadd.f32 %v1254_v4, %v1108_v6 }
 0x1c5   : > { %v2480_v13 = vpop.f32.mrf.mxu0  ;;  %v1140_v50 = vadd.f32 %v1139_v8, %v1004_v46 }
 0x1c6   : > { %v2502_v15 = vpop.f32.mrf.mxu1  ;;  %v1273_v34 = vadd.f32 %v2480_v13, %v1132_v3  ;;  %v1445_v3 = vsel %vm546_vm0, %v1419_v47, 0 }
 0x1c7   : > { %v1266_v30 = vpop.f32.mrf.mxu0  ;;  %v1370_v33 = vadd.f32 %v2502_v15, %v1249_v56 }
 0x1c8   : > { %v1363_v37 = vpop.f32.mrf.mxu1  ;;  %v1267_v35 = vadd.f32 %v1266_v30, %v1124_v36  ;;  %v1442_v30 = vsel %vm546_vm0, %v1418_v61, 0 }
 0x1c9   : > { %v2483_v57 = vpop.f32.mrf.mxu0  ;;  %v1364_v8 = vadd.f32 %v1363_v37, %v1243_v17  ;;  %v3336_v18 = vand.u32 4294901760, %v1442_v30 }
 0x1ca   : > { %v2505_v32 = vpop.f32.mrf.mxu1  ;;  %v1285_v1 = vadd.f32 %v2483_v57, %v1148_v52 }
 0x1cb   : > { %v1382_v20 = vadd.f32 %v2505_v32, %v1261_v23  ;;  %v1278_v28 = vpop.f32.mrf.mxu0  ;;  %v3362_v7 = vsub.f32 %v1442_v30, %v3336_v18 }
 0x1cc   : > { %v1375_v60 = vpop.f32.mrf.mxu1  ;;  %v1279_v5 = vadd.f32 %v1278_v28, %v1140_v50 }
 0x1cd   : > { %v1376_v54 = vadd.f32 %v1375_v60, %v1255_v62  ;;  %v1532_v28 = vand.u32 4294901760, %v3362_v7 }
 0x1ce   : > { %v2508_v38 = vpop.f32.mrf.mxu1 }
 0x1cf   : > { %v1394_v58 = vadd.f32 %v2508_v38, %v1273_v34 }
 0x1d0   : > { %v1387_v45 = vpop.f32.mrf.mxu1 }
 0x1d1   : > { %2708 = vtanh.f32 %v1394_v58  ;;  %v1388_v63 = vadd.f32 %v1387_v45, %v1267_v35  ;;  %v1523_v58 = vsub.f32 %v3325_v22, %v1522_v2 }
 0x1d2   : > { %2710 = vtanh.f32 %v1382_v20  ;;  %v2511_v0 = vpop.f32.mrf.mxu1  ;;  %v3370_v20 = vand.u32 4294901760, %v1445_v3 }
 0x1d3   : > { %2712 = vtanh.f32 %v1388_v63  ;;  %v1406_v10 = vadd.f32 %v2511_v0, %v1285_v1  ;;  %v1524_v56 = vand.u32 4294901760, %v1523_v58 }
 0x1d4   : > { %v1399_v4 = vpop.f32.mrf.mxu1  ;;  %v3396_v50 = vsub.f32 %v1445_v3, %v3370_v20 }
 0x1d5   : > { %2714 = vtanh.f32 %v1406_v10  ;;  %v1400_v11 = vadd.f32 %v1399_v4, %v1279_v5  ;;  %v1533_v5 = vsub.f32 %v3362_v7, %v1532_v28 }
 0x1d6   : > { %2716 = vtanh.f32 %v1376_v54  ;;  %v1542_v17 = vand.u32 4294901760, %v3396_v50 }
 0x1d7   : > { %2718 = vtanh.f32 %v1400_v11 }
 0x1d8   : > { %2720 = vtanh.f32 %v1370_v33  ;;  %v1543_v53 = vsub.f32 %v3396_v50, %v1542_v17 }
 0x1d9   : > { %2722 = vtanh.f32 %v1364_v8  ;;  %v1534_v8 = vand.u32 4294901760, %v1533_v5 }
 0x1da   : > { %v1544_v61 = vand.u32 4294901760, %v1543_v53 }
 0x1de   : > { %v2709_v13 = vpop.eup %2708 }
 0x1df   : > { %v2711_v14 = vpop.eup %2710  ;;  %v3304_v19 = vand.u32 4294901760, %v2709_v13 }
 0x1e0   : > { %v2713_v15 = vpop.eup %2712  ;;  %v3316_v43 = vand.u32 4294901760, %v2711_v14 }
 0x1e1   : > { %v3311_v24 = vand.u32 4294901760, %v2713_v15  ;;  %v3319_v44 = vsub.f32 %v2709_v13, %v3304_v19 }
 0x1e2   : > { %v2715_v25 = vpop.eup %2714  ;;  %v3349_v57 = vsub.f32 %v2711_v14, %v3316_v43 }
 0x1e3   : > { %v2717_v37 = vpop.eup %2716  ;;  %v3314_v42 = vand.u32 4294901760, %v2715_v25  ;;  %v3334_v59 = vsub.f32 %v2713_v15, %v3311_v24  ;;  %v1583_v23 = vand.u32 4294901760, %v3319_v44 }
 0x1e4   : > { %v2719_v48 = vpop.eup %2718  ;;  %v3339_v40 = vand.u32 4294901760, %v2717_v37  ;;  %v1597_v35 = vand.u32 4294901760, %v3349_v57 }
 0x1e5   : > { %v2721_v49 = vpop.eup %2720  ;;  %2513 = vmatpush3.msra.mxu0 %v3314_v42  ;;  %v3328_v32 = vand.u32 4294901760, %v2719_v48  ;;  %v3331_v55 = vsub.f32 %v2715_v25, %v3314_v42  ;;  %v1590_v34 = vand.u32 4294901760, %v3334_v59  ;;  %v1584_v52 = vsub.f32 %v3319_v44, %v1583_v23 }
 0x1e6   : > { %2514 = vmatprep.subr.mxu0 %v2749_v31  ;;  %v2723_v51 = vpop.eup %2722  ;;  %v3352_v60 = vand.u32 4294901760, %v2721_v49  ;;  %v3368_v6 = vsub.f32 %v2717_v37, %v3339_v40  ;;  %v1598_v63 = vsub.f32 %v3349_v57, %v1597_v35 }
 0x1e7   : > { %2515 = vmatpush3.msra.mxu0 %v3328_v32  ;;  %v1569_v26 = vand.u32 4294901760, %v3331_v55  ;;  %v3345_v12 = vsub.f32 %v2719_v48, %v3328_v32  ;;  %v3365_v41 = vand.u32 4294901760, %v2723_v51  ;;  %v1591_v62 = vsub.f32 %v3334_v59, %v1590_v34 }
 0x1e8   : > { %2516 = vmatprep.subr.mxu0 %v2749_v31  ;;  %v3385_v27 = vsub.f32 %v2721_v49, %v3352_v60  ;;  %v1604_v45 = vand.u32 4294901760, %v3368_v6  ;;  %v1585_v1 = vand.u32 4294901760, %v1584_v52  ;;  %v1599_v33 = vand.u32 4294901760, %v1598_v63 }
 0x1e9   : > { %2517 = vmatpush3.msra.mxu0 %v3304_v19  ;;  %v1570_v16 = vsub.f32 %v3331_v55, %v1569_v26  ;;  %v1576_v36 = vand.u32 4294901760, %v3345_v12  ;;  %v3403_v9 = vsub.f32 %v2723_v51, %v3365_v41  ;;  %v1592_v0 = vand.u32 4294901760, %v1591_v62 }
 0x1ea   : > { %2518 = vmatprep.subr.mxu0 %v2749_v31  ;;  %v1611_v54 = vand.u32 4294901760, %v3385_v27  ;;  %v1605_v10 = vsub.f32 %v3368_v6, %v1604_v45 }
 0x1eb   : > { %2519 = vmatpush3.msra.mxu0 %v3311_v24  ;;  %v1571_v38 = vand.u32 4294901760, %v1570_v16  ;;  %v1577_v46 = vsub.f32 %v3345_v12, %v1576_v36  ;;  %v1618_v4 = vand.u32 4294901760, %v3403_v9 }
 0x1ec   : > { %2520 = vmatprep.subr.mxu0 %v2749_v31  ;;  %v1612_v11 = vsub.f32 %v3385_v27, %v1611_v54  ;;  %v1606_v39 = vand.u32 4294901760, %v1605_v10 }
 0x1ed   : > { %2521 = vmatpush3.msra.mxu0 %v3316_v43  ;;  %2538 = vmatpush3.msra.mxu1 %v1571_v38  ;;  %v1578_v29 = vand.u32 4294901760, %v1577_v46  ;;  %v1619_v13 = vsub.f32 %v3403_v9, %v1618_v4 }
 0x1ee   : > { %2522 = vmatprep.subr.mxu0 %v2749_v31  ;;  %2539 = vmatprep.subr.mxu1 %v2749_v31  ;;  %v1613_v14 = vand.u32 4294901760, %v1612_v11 }
 0x1ef   : > { %2523 = vmatpush3.msra.mxu0 %v3339_v40  ;;  %2540 = vmatpush3.msra.mxu1 %v1578_v29  ;;  %v1620_v15 = vand.u32 4294901760, %v1619_v13 }
 0x1f0   : > { %2524 = vmatprep.subr.mxu0 %v2749_v31  ;;  %2541 = vmatprep.subr.mxu1 %v2749_v31 }
 0x1f1   : > { %2525 = vmatpush3.msra.mxu0 %v3352_v60  ;;  %2542 = vmatpush3.msra.mxu1 %v1585_v1 }
 0x1f2   : > { %2526 = vmatprep.subr.mxu0 %v2749_v31  ;;  %2543 = vmatprep.subr.mxu1 %v2749_v31 }
 0x1f3   : > { %2527 = vmatpush3.msra.mxu0 %v3365_v41  ;;  %2544 = vmatpush3.msra.mxu1 %v1592_v0 }
 0x1f4   : > { %2529 = vmatmul.mubr.f32.vlgmr.msra.gmra.mxu0 %v1524_v56  ;;  %2545 = vmatprep.subr.mxu1 %v2749_v31 }
 0x1f5   : > { %2562 = vmatprep.subr.mxu0 %v2749_v31  ;;  %2546 = vmatpush3.msra.mxu1 %v1599_v33 }
 0x1f6   : > { %2563 = vmatpush3.msra.mxu0 %v3331_v55  ;;  %2547 = vmatprep.subr.mxu1 %v2749_v31 }
 0x1f7   : > { %2564 = vmatprep.subr.mxu0 %v2749_v31  ;;  %2531 = vmatprep.mubr.msk.f32.mxu0 %vm2750_vm1, %v2749_v31 }
 0x1f8   : > { %2548 = vmatpush3.msra.mxu1 %v1606_v39  ;;  %2565 = vmatpush3.msra.mxu0 %v3345_v12  ;;  %v1426_v12 = vpop.permute.xlu0 %1425 }
 0x1f9   : > { %2532 = vmatmul.mubr.f32.gmra.mxu0 %v1534_v8  ;;  %2549 = vmatprep.subr.mxu1 %v2749_v31 }
 0x1fa   : > { %2566 = vmatprep.subr.mxu0 %v2749_v31  ;;  %2550 = vmatpush3.msra.mxu1 %v1613_v14 }
 0x1fb   : > { %2567 = vmatpush3.msra.mxu0 %v3319_v44  ;;  %2551 = vmatprep.subr.mxu1 %v2749_v31 }
 0x1fc   : > { %2568 = vmatprep.subr.mxu0 %v2749_v31  ;;  %2534 = vmatprep.mubr.msk.f32.mxu0 %vm2750_vm1, %v2749_v31  ;;  %v1436_v52 = vpop.permute.xlu0 %1435 }
 0x1fd   : > { %2552 = vmatpush3.msra.mxu1 %v1620_v15  ;;  %2569 = vmatpush3.msra.mxu0 %v3334_v59 }
 0x1fe   : > { %2535 = vmatmul.mubr.f32.gmra.mxu0 %v1544_v61  ;;  %2554 = vmatmul.mubr.f32.vlgmr.msra.gmra.mxu1 %v3309_v21 }
 0x1ff   : > { %2570 = vmatprep.subr.mxu0 %v2749_v31  ;;  %2587 = vmatprep.subr.mxu1 %v2749_v31 }
 0x200   : > { %2571 = vmatpush3.msra.mxu0 %v3349_v57  ;;  %2588 = vmatpush3.msra.mxu1 %v3314_v42 }
 0x201   : > { %2572 = vmatprep.subr.mxu0 %v2749_v31  ;;  %2589 = vmatprep.subr.mxu1 %v2749_v31 }
 0x202   : > { %2556 = vmatprep.mubr.msk.f32.mxu1 %vm2750_vm1, %v2749_v31  ;;  %2573 = vmatpush3.msra.mxu0 %v3368_v6 }
 0x203   : > { %2590 = vmatpush3.msra.mxu1 %v3328_v32  ;;  %2574 = vmatprep.subr.mxu0 %v2749_v31 }
 0x204   : > { %2557 = vmatmul.mubr.f32.gmra.mxu1 %v3336_v18  ;;  %2591 = vmatprep.subr.mxu1 %v2749_v31 }
 0x205   : > { %2575 = vmatpush3.msra.mxu0 %v3385_v27  ;;  %2592 = vmatpush3.msra.mxu1 %v3304_v19 }
 0x206   : > { %2576 = vmatprep.subr.mxu0 %v2749_v31  ;;  %2593 = vmatprep.subr.mxu1 %v2749_v31 }
 0x207   : > { %2559 = vmatprep.mubr.msk.f32.mxu1 %vm2750_vm1, %v2749_v31  ;;  %2577 = vmatpush3.msra.mxu0 %v3403_v9 }
 0x208   : > { %2578 = vmatprep.mubr.msk.f32.mxu0 %vm2750_vm1, %v2749_v31  ;;  %2594 = vmatpush3.msra.mxu1 %v3311_v24 }
 0x209   : > { %2560 = vmatmul.mubr.f32.gmra.mxu1 %v3370_v20  ;;  %2579 = vmatmul.mubr.f32.vlgmr.msra.gmra.mxu0 %v3325_v22 }
 0x20a   : > { %2595 = vmatprep.subr.mxu1 %v2749_v31  ;;  %2612 = vmatprep.subr.mxu0 %v2749_v31 }
 0x20b   : > { %2596 = vmatpush3.msra.mxu1 %v3316_v43  ;;  %2613 = vmatpush3.msra.mxu0 %v1569_v26 }
 0x20c   : > { %2597 = vmatprep.subr.mxu1 %v2749_v31  ;;  %2614 = vmatprep.subr.mxu0 %v2749_v31 }
 0x20d   : > { %2581 = vmatprep.mubr.msk.f32.mxu0 %vm2750_vm1, %v2749_v31  ;;  %2598 = vmatpush3.msra.mxu1 %v3339_v40 }
 0x20e   : > { %2615 = vmatpush3.msra.mxu0 %v1576_v36  ;;  %2599 = vmatprep.subr.mxu1 %v2749_v31 }
 0x20f   : > { %2582 = vmatmul.mubr.f32.gmra.mxu0 %v3362_v7  ;;  %2616 = vmatprep.subr.mxu0 %v2749_v31 }
 0x210   : > { %2600 = vmatpush3.msra.mxu1 %v3352_v60  ;;  %2617 = vmatpush3.msra.mxu0 %v1583_v23 }
 0x211   : > { %2601 = vmatprep.subr.mxu1 %v2749_v31  ;;  %2618 = vmatprep.subr.mxu0 %v2749_v31 }
 0x212   : > { %2584 = vmatprep.mubr.msk.f32.mxu0 %vm2750_vm1, %v2749_v31  ;;  %2602 = vmatpush3.msra.mxu1 %v3365_v41 }
 0x213   : > { %2603 = vmatprep.mubr.msk.f32.mxu1 %vm2750_vm1, %v2749_v31  ;;  %2619 = vmatpush3.msra.mxu0 %v1590_v34  ;;  %v1431_v34 = vpop.permute.xlu1 %1430 }
 0x214   : > { %2585 = vmatmul.mubr.f32.gmra.mxu0 %v3396_v50  ;;  %2604 = vmatmul.mubr.f32.vlgmr.msra.gmra.mxu1 %v1522_v2 }
 0x215   : > { %2620 = vmatprep.subr.mxu0 %v2749_v31  ;;  %2637 = vmatprep.subr.mxu1 %v2749_v31 }
 0x216   : > { %2621 = vmatpush3.msra.mxu0 %v1597_v35  ;;  %2638 = vmatpush3.msra.mxu1 %v3314_v42 }
 0x217   : > { %2622 = vmatprep.subr.mxu0 %v2749_v31  ;;  %2639 = vmatprep.subr.mxu1 %v2749_v31 }
 0x218   : > { %2606 = vmatprep.mubr.msk.f32.mxu1 %vm2750_vm1, %v2749_v31  ;;  %2623 = vmatpush3.msra.mxu0 %v1604_v45 }
 0x219   : > { %2640 = vmatpush3.msra.mxu1 %v3328_v32  ;;  %2624 = vmatprep.subr.mxu0 %v2749_v31 }
 0x21a   : > { %2607 = vmatmul.mubr.f32.gmra.mxu1 %v1532_v28  ;;  %2641 = vmatprep.subr.mxu1 %v2749_v31 }
 0x21b   : > { %2625 = vmatpush3.msra.mxu0 %v1611_v54  ;;  %2642 = vmatpush3.msra.mxu1 %v3304_v19 }
 0x21c   : > { %2626 = vmatprep.subr.mxu0 %v2749_v31  ;;  %2643 = vmatprep.subr.mxu1 %v2749_v31 }
 0x21d   : > { %2609 = vmatprep.mubr.msk.f32.mxu1 %vm2750_vm1, %v2749_v31  ;;  %2627 = vmatpush3.msra.mxu0 %v1618_v4 }
 0x21e   : > { %2628 = vmatprep.mubr.msk.f32.mxu0 %vm2750_vm1, %v2749_v31  ;;  %2644 = vmatpush3.msra.mxu1 %v3311_v24 }
 0x21f   : > { %2610 = vmatmul.mubr.f32.gmra.mxu1 %v1542_v17  ;;  %2629 = vmatmul.mubr.f32.vlgmr.msra.gmra.mxu0 %v3309_v21 }
 0x220   : > { %2645 = vmatprep.subr.mxu1 %v2749_v31  ;;  %2631 = vmatprep.mubr.msk.f32.mxu0 %vm2750_vm1, %v2749_v31 }
 0x221   : > { %2646 = vmatpush3.msra.mxu1 %v3316_v43  ;;  %2653 = vmatprep.mubr.msk.f32.mxu1 %vm2750_vm1, %v2749_v31 }
 0x222   : > { %2647 = vmatprep.subr.mxu1 %v2749_v31 }
 0x223   : > { %2648 = vmatpush3.msra.mxu1 %v3339_v40  ;;  %2632 = vmatmul.mubr.f32.gmra.mxu0 %v3336_v18 }
 0x224   : > { %2649 = vmatprep.subr.mxu1 %v2749_v31  ;;  %2634 = vmatprep.mubr.msk.f32.mxu0 %vm2750_vm1, %v2749_v31 }
 0x225   : > { %2650 = vmatpush3.msra.mxu1 %v3352_v60 }
 0x226   : > { %2651 = vmatprep.subr.mxu1 %v2749_v31 }
 0x227   : > { %2652 = vmatpush3.msra.mxu1 %v3365_v41  ;;  %2635 = vmatmul.mubr.f32.gmra.mxu0 %v3370_v20 }
 0x228   : > { %2654 = vmatmul.mubr.f32.vlgmr.msra.gmra.mxu1 %v3309_v21 }
 0x229   : > { %2656 = vmatprep.mubr.msk.f32.mxu1 %vm2750_vm1, %v2749_v31 }
 0x22c   : > { %2657 = vmatmul.mubr.f32.gmra.mxu1 %v3336_v18 }
 0x22d   : > { %2659 = vmatprep.mubr.msk.f32.mxu1 %vm2750_vm1, %v2749_v31 }
 0x230   : > { %2660 = vmatmul.mubr.f32.gmra.mxu1 %v3370_v20 }
 0x2b4   : > { %v1526_v19 = vpop.f32.mrf.mxu0 }
 0x2b5   : > { %v1527_v23 = vadd.f32 %v1526_v19, %v1426_v12 }
 0x2b6   : > { %v2530_v24 = vpop.f32.mrf.mxu0 }
 0x2b9   : > { %v1536_v25 = vpop.f32.mrf.mxu0 }
 0x2ba   : > { %v1537_v7 = vadd.f32 %v1536_v25, %v1431_v34 }
 0x2bb   : > { %v2533_v30 = vpop.f32.mrf.mxu0 }
 0x2be   : > { %v1546_v37 = vpop.f32.mrf.mxu0  ;;  %v1657_v42 = vpop.f32.mrf.mxu1 }
 0x2bf   : > { %v1658_v2 = vadd.f32 %v1657_v42, %v1527_v23  ;;  %v1547_v35 = vadd.f32 %v1546_v37, %v1436_v52 }
 0x2c0   : > { %v2555_v43 = vpop.f32.mrf.mxu1  ;;  %v2536_v44 = vpop.f32.mrf.mxu0 }
 0x2c4   : > { %v1663_v47 = vpop.f32.mrf.mxu1 }
 0x2c5   : > { %v1664_v20 = vadd.f32 %v1663_v47, %v1537_v7 }
 0x2c6   : > { %v2558_v21 = vpop.f32.mrf.mxu1 }
 0x2c9   : > { %v1669_v48 = vpop.f32.mrf.mxu1  ;;  %v1757_v22 = vpop.f32.mrf.mxu0 }
 0x2ca   : > { %v1758_v41 = vadd.f32 %v1757_v22, %v1658_v2  ;;  %v1670_v28 = vadd.f32 %v1669_v48, %v1547_v35 }
 0x2cb   : > { %v2580_v49 = vpop.f32.mrf.mxu0  ;;  %v2561_v32 = vpop.f32.mrf.mxu1 }
 0x2cf   : > { %v1764_v55 = vpop.f32.mrf.mxu0 }
 0x2d0   : > { %v1765_v58 = vadd.f32 %v1764_v55, %v1664_v20 }
 0x2d1   : > { %v2583_v59 = vpop.f32.mrf.mxu0 }
 0x2d4   : > { %v1771_v31 = vpop.f32.mrf.mxu0  ;;  %v1852_v18 = vpop.f32.mrf.mxu1 }
 0x2d5   : > { %v1853_v38 = vadd.f32 %v1852_v18, %v1758_v41  ;;  %v1772_v9 = vadd.f32 %v1771_v31, %v1670_v28 }
 0x2d6   : > { %v2605_v40 = vpop.f32.mrf.mxu1  ;;  %v2586_v3 = vpop.f32.mrf.mxu0 }
 0x2da   : > { %v1860_v51 = vpop.f32.mrf.mxu1 }
 0x2db   : > { %v1861_v45 = vadd.f32 %v1860_v51, %v1765_v58 }
 0x2dc   : > { %v2608_v26 = vpop.f32.mrf.mxu1 }
 0x2df   : > { %v1868_v57 = vpop.f32.mrf.mxu1  ;;  %v1963_v60 = vpop.f32.mrf.mxu0 }
 0x2e0   : > { %v1964_v27 = vadd.f32 %v1963_v60, %v1853_v38  ;;  %v1869_v0 = vadd.f32 %v1868_v57, %v1772_v9 }
 0x2e1   : > { %v2630_v16 = vpop.f32.mrf.mxu0  ;;  %v2611_v36 = vpop.f32.mrf.mxu1 }
 0x2e3   : > { %v1969_v6 = vpop.f32.mrf.mxu0 }
 0x2e4   : > { %v1970_v56 = vadd.f32 %v1969_v6, %v1861_v45 }
 0x2e5   : > { %v2633_v46 = vpop.f32.mrf.mxu0 }
 0x2e7   : > { %v1975_v29 = vpop.f32.mrf.mxu0 }
 0x2e8   : > { %v2054_v62 = vpop.f32.mrf.mxu1  ;;  %v1976_v17 = vadd.f32 %v1975_v29, %v1869_v0 }
 0x2e9   : > { %v2055_v50 = vadd.f32 %v2054_v62, %v1964_v27  ;;  %v2636_v1 = vpop.f32.mrf.mxu0 }
 0x2ea   : > { %v2655_v63 = vpop.f32.mrf.mxu1 }
 0x2eb   : > { %2070 = vst [vmem:[%s292_s27] sm:$0xff] %v2055_v50 }
 0x2ec   : > { %v2060_v54 = vpop.f32.mrf.mxu1 }
 0x2ed   : > { %v2061_v5 = vadd.f32 %v2060_v54, %v1970_v56 }
 0x2ee   : > { %v2658_v10 = vpop.f32.mrf.mxu1 }
 0x2ef   : > { %2071 = vst [vmem:[%s292_s27 + $0x8] sm:$0xff] %v2061_v5  ;;  %2079 = sbr.rel (!%p2821_p4) target bundleno = 764 (0x2fc), region = 56 }
 0x2f0   : > { %v2066_v33 = vpop.f32.mrf.mxu1 }
 0x2f1   : > { %v2067_v4 = vadd.f32 %v2066_v33, %v1976_v17 }
 0x2f2   : > { %v2661_v11 = vpop.f32.mrf.mxu1  ;;  %v2114_v8 = vld [vmem:[%s292_s27] sm:$0xff] (%p2821_p4) }
 0x2f3   : > { %2072 = vst [vmem:[%s292_s27 + $0x10] sm:$0xff] %v2067_v4  ;;  %2115 = vst [vmem:[%s2081_s20] sm:$0xff] (%p2821_p4), %v2114_v8 }
 0x2f6   : > { %v2116_v39 = vld [vmem:[%s292_s27 + $0x8] sm:$0xff] }
 0x2f7   : > { %2117 = vst [vmem:[%s2081_s20 + $0x10] sm:$0xff] %v2116_v39 }
 0x2fa   : > { %v2118_v53 = vld [vmem:[%s292_s27 + $0x10] sm:$0xff] }
 0x2fb   : > { %2119 = vst [vmem:[%s2081_s20 + $0x20] sm:$0xff] %v2118_v53 }
 0x2fc PF: > { %p15_p8 = scmp.ge.s32.totalorder %s2811_s9, 4   ;;  %s3582_s27 = smov %s2742_s28 }
 0x2fd   : > { %s3583_s28 = smov %s2819_s12  ;;  %s3584_s29 = smov %s2811_s9 }
 0x2fe   :  { %17 = sbr.rel (!%p15_p8) target bundleno = 2 (0x2), region = 120 }

</bundles_post_ra>
